<compile_context>
chip_gen: v5e
topology: v5e:2x2
jax: 0.10.0
libtpu: 0.0.40
codegen_flags: <defaults>
</compile_context>

<pallas_src>
import functools
import math

import numpy as np
import jax
import jax.numpy as jnp
from jax.experimental import pallas as pl
from jax.experimental.pallas import tpu as pltpu


def _styled_conv_kernel(style_ref, modw_ref, modb_ref, w_ref, xa_ref, xb_ref,
                        noise_ref, nw_ref, actb_ref, o_ref, xe_ref, wmod_ref, *,
                        ksize, W, tile, edge, pad):
    j = pl.program_id(1)                      # spatial (row-tile) index
    sliver = 2 * pad * W                      # bottom-halo rows, flattened

    # ---- style modulation + demodulation: once per batch element ------------
    # (grid = (B, NT) with the batch axis "parallel" and the HW axis
    # "arbitrary", so every core runs j == 0 first for each of its batches.)
    @pl.when(j == 0)
    def _():
        # s = EqualLinear(style): lane-major over Cin (mod_w passed transposed).
        s = jnp.sum(modw_ref[...] * style_ref[0], axis=0, keepdims=True)
        s = s + modb_ref[...]                                  # (1, Cin)
        w = w_ref[...].astype(jnp.float32) * s[None]           # (k*k, Cout, Cin)
        demod = jax.lax.rsqrt(jnp.sum(w * w, axis=(0, 2), keepdims=True) + 1e-8)
        wmod_ref[...] = (w * demod).astype(jnp.bfloat16)       # bf16 MXU operand

    # ---- assemble the haloed, lane-dense input tile (bf16) -------------------
    # xa = this tile's R rows, xb = the 2*pad bottom-halo rows (both delivered
    # by the auto-pipeline).  Vertical "same" padding comes from the wrapper's
    # pre-padded rows; the `edge` slack on each side is only ever read at
    # horizontally-wrapped lanes, which are masked below.
    xe_ref[:, edge:edge + tile] = xa_ref[0]
    xe_ref[:, edge + tile:edge + tile + sliver] = xb_ref[0, 0]

    # ---- horizontal-wrap masks, hoisted out of the tap loop (k-1 masks) ------
    col = jax.lax.broadcasted_iota(jnp.int32, (1, tile), 1) % W
    masks = {dx: jnp.logical_and(col + dx >= 0, col + dx < W)
             for dx in range(-pad, pad + 1) if dx != 0}
    zero = jnp.zeros((), jnp.bfloat16)

    # ---- k*k conv taps: bf16 MXU matmuls, f32 accumulation in the out block --
    first = True
    for ky in range(ksize):
        for kx in range(ksize):
            dx = kx - pad
            off = edge + ky * W + dx
            patch = xe_ref[:, off:off + tile]                  # (Cin, tile) bf16
            if dx != 0:                                        # mask row wrap
                patch = jnp.where(masks[dx], patch, zero)
            contrib = jnp.dot(wmod_ref[ky * ksize + kx], patch,
                              preferred_element_type=jnp.float32)
            if first:
                o_ref[0] = contrib
                first = False
            else:
                o_ref[0] += contrib

    # ---- noise injection + FusedLeakyReLU epilogue ---------------------------
    y = o_ref[0] + nw_ref[0] * noise_ref[0] + actb_ref[...]
    o_ref[0] = jnp.where(y >= 0.0, y, 0.2 * y) * math.sqrt(2.0)


def styled_conv_forward(x, style, noise, params, *, ksize, hw_tile=None):
    B, Cin, H, W = x.shape
    Cout = params["conv_w"].shape[0]
    S = style.shape[1]
    HW = H * W
    pad = ksize // 2
    kk = ksize * ksize

    # ---- spatial tile selection (multiple of 128 lanes, whole rows, and the
    # rows-per-tile must be a multiple of 2*pad so the halo sliver is blocked).
    if hw_tile is None:
        hw_tile = HW
        for t in (2048, 1024, 512, 256, 128):
            if HW % t == 0 and t % W == 0 and (t // W) % (2 * pad) == 0:
                hw_tile = t
                break
    assert HW % hw_tile == 0 and hw_tile % W == 0
    R = hw_tile // W
    assert R % (2 * pad) == 0, "rows per tile must be a multiple of 2*pad"
    NT = HW // hw_tile
    SL = 2 * pad * W

    conv_scale = 1.0 / math.sqrt(Cin * ksize * ksize)    # ModulatedConv2d.scale
    mod_scale = 1.0 / math.sqrt(S)                       # EqualLinear.scale

    # ---- static scales folded once; weight re-laid out tap-major, bf16.
    conv_w_t = jnp.transpose(params["conv_w"] * conv_scale,
                             (2, 3, 0, 1)).reshape(kk, Cout, Cin)
    conv_w_t = conv_w_t.astype(jnp.bfloat16)             # (k*k, Cout, Cin)
    mod_w_t = (params["mod_w"] * mod_scale).T            # (S, Cin), f32
    mod_b = params["mod_b"].reshape(1, Cin)
    act_b = params["act_b"].reshape(Cout, 1)             # lane-broadcast layout
    style3 = style.reshape(B, S, 1)

    # ---- bf16 input, rows pre-padded (vertical "same" halo), lane-dense flat.
    x_pad = jnp.pad(x, ((0, 0), (0, 0), (pad, pad), (0, 0))).astype(jnp.bfloat16)
    x_flat = x_pad.reshape(B, Cin, (H + 2 * pad) * W)     # (B, Cin, HWp)
    # Bottom-halo rows for every tile, gathered once (tiny: 2*pad rows / tile).
    rows = (np.arange(NT)[:, None] * R + R + np.arange(2 * pad)[None, :]).reshape(-1)
    x_halo = jnp.take(x_pad, jnp.asarray(rows, dtype=jnp.int32), axis=2)
    x_halo = x_halo.reshape(B, Cin, NT, SL).transpose(0, 2, 1, 3)  # (B,NT,Cin,SL)

    noise_flat = noise.reshape(B, 1, HW)                  # f32 epilogue add

    EDGE = 128                                            # >= pad; keeps stores aligned
    XE_W = EDGE + hw_tile + SL + EDGE

    # ---- generation-aware VMEM budget (48 MiB on v7x, ~96 MiB on v5e/v6e).
    try:
        vmem_cap = int(pltpu.get_tpu_info().vmem_capacity_bytes)
    except Exception:
        vmem_cap = 64 * 1024 * 1024
    vmem_limit = min(vmem_cap * 3 // 4, 100 * 1024 * 1024)

    kern = functools.partial(_styled_conv_kernel, ksize=ksize, W=W,
                             tile=hw_tile, edge=EDGE, pad=pad)

    out_flat = pl.pallas_call(
        kern,
        out_shape=jax.ShapeDtypeStruct((B, Cout, HW), jnp.float32),
        grid=(B, NT),
        in_specs=[
            pl.BlockSpec((1, S, 1), lambda b, j: (b, 0, 0)),         # style
            pl.BlockSpec((S, Cin), lambda b, j: (0, 0)),             # mod weight^T (pre-scaled)
            pl.BlockSpec((1, Cin), lambda b, j: (0, 0)),             # mod bias
            # TODO(synk): pipeline_mode=pl.Buffered(1) to drop the 2nd buffer
            # of this constant-index weight.
            pl.BlockSpec((kk, Cout, Cin), lambda b, j: (0, 0, 0)),   # conv weight, tap-major bf16
            pl.BlockSpec((1, Cin, hw_tile), lambda b, j: (b, 0, j)),  # x main tile (bf16, padded rows)
            pl.BlockSpec((1, 1, Cin, SL), lambda b, j: (b, j, 0, 0)),  # x bottom-halo rows
            pl.BlockSpec((1, 1, hw_tile), lambda b, j: (b, 0, j)),   # noise tile
            pl.BlockSpec(memory_space=pltpu.MemorySpace.SMEM),       # noise weight (1,)
            pl.BlockSpec((Cout, 1), lambda b, j: (0, 0)),            # activation bias
        ],
        out_specs=pl.BlockSpec((1, Cout, hw_tile), lambda b, j: (b, 0, j)),
        scratch_shapes=[
            pltpu.VMEM((Cin, XE_W), jnp.bfloat16),                   # haloed input tile
            pltpu.VMEM((kk, Cout, Cin), jnp.bfloat16),               # per-batch modulated weight
        ],
        compiler_params=pltpu.CompilerParams(
            dimension_semantics=("parallel", "arbitrary"),
            vmem_limit_bytes=vmem_limit),
    )(style3, mod_w_t, mod_b, conv_w_t, x_flat, x_halo, noise_flat,
      params["noise_w"], act_b)

    return out_flat.reshape(B, Cout, H, W)


def ref_forward(x, style, noise, p, *, ksize):
    """Pure-JAX reference matching the PyTorch semantics."""
    B, Cin, H, W = x.shape
    Cout = p["conv_w"].shape[0]
    S = style.shape[1]
    conv_scale = 1.0 / math.sqrt(Cin * ksize * ksize)
    mod_scale = 1.0 / math.sqrt(S)
    s = style @ (p["mod_w"] * mod_scale).T + p["mod_b"][0]            # (B,Cin)
    w = conv_scale * p["conv_w"][None] * s[:, None, :, None, None]    # (B,Cout,Cin,k,k)
    demod = 1.0 / jnp.sqrt(jnp.sum(w * w, axis=(2, 3, 4)) + 1e-8)
    w = w * demod[:, :, None, None, None]
    pad = ksize // 2
    outs = []
    for b in range(B):
        outs.append(jax.lax.conv_general_dilated(
            x[b:b + 1], w[b], (1, 1), ((pad, pad), (pad, pad)),
            dimension_numbers=("NCHW", "OIHW", "NCHW")))
    out = jnp.concatenate(outs, 0)
    out = out + p["noise_w"][0] * noise
    out = out + p["act_b"][0][None, :, None, None]
    return jnp.where(out >= 0, out, 0.2 * out) * math.sqrt(2.0)


if __name__ == "__main__":
    B, Cin, Cout, K, S, H = 2, 4, 4, 3, 8, 16
    key = jax.random.PRNGKey(0)
    k1, k2, k3, k4, k5, k6, k7 = jax.random.split(key, 7)

    x = jax.random.normal(k1, (B, Cin, H, H), jnp.float32)
    style = jax.random.normal(k2, (B, S), jnp.float32)
    noise = jax.random.normal(k3, (B, 1, H, H), jnp.float32)

    # Deterministic parameters.  noise_w / act_b are nonzero so the noise and
    # bias paths are actually validated (per review).
    params = dict(
        conv_w=jax.random.normal(k4, (Cout, Cin, K, K), jnp.float32),
        mod_w=jax.random.normal(k5, (Cin, S), jnp.float32),
        mod_b=jnp.ones((1, Cin), jnp.float32),                 # bias_init=1
        noise_w=0.5 + 0.1 * jax.random.normal(k6, (1,), jnp.float32),
        act_b=0.1 * jax.random.normal(k7, (1, Cout), jnp.float32),
    )

    # hw_tile=128 -> 2 spatial tiles per batch: exercises the tiled path and
    # the once-per-batch weight prep guard.
    out = styled_conv_forward(x, style, noise, params, ksize=K, hw_tile=128)
    jax.block_until_ready(out)

    ref = ref_forward(x, style, noise, params, ksize=K)
    max_err = float(np.max(np.abs(np.asarray(out) - np.asarray(ref))))
    assert np.allclose(np.asarray(out), np.asarray(ref), atol=3e-2, rtol=3e-2), max_err
    print("KERNEL_OK")
</pallas_src>

<mosaic_0001>
module attributes {stable_mosaic.version = 11 : i64} {
  func.func @_styled_conv_kernel(%arg0: i32, %arg1: i32, %arg2: memref<1x8x1xf32, #tpu.memory_space<vmem>>, %arg3: memref<8x4xf32, #tpu.memory_space<vmem>>, %arg4: memref<1x4xf32, #tpu.memory_space<vmem>>, %arg5: memref<9x4x4xbf16, #tpu.memory_space<vmem>>, %arg6: memref<1x4x128xbf16, #tpu.memory_space<vmem>>, %arg7: memref<1x1x4x32xbf16, #tpu.memory_space<vmem>>, %arg8: memref<1x1x128xf32, #tpu.memory_space<vmem>>, %arg9: memref<1xf32, #tpu.memory_space<smem>>, %arg10: memref<4x1xf32, #tpu.memory_space<vmem>>, %arg11: memref<1x4x128xf32, #tpu.memory_space<vmem>>, %arg12: memref<4x416xbf16, #tpu.memory_space<vmem>>, %arg13: memref<9x4x4xbf16, #tpu.memory_space<vmem>>) attributes {dimension_semantics = [#tpu.dimension_semantics<parallel>, #tpu.dimension_semantics<arbitrary>], iteration_bounds = array<i64: 2, 2>, scalar_prefetch = 0 : i64, scratch_operands = 2 : i64, tpu.core_type = #tpu.core_type<tc>, window_params = [{transform_indices = @transform_0, window_bounds = array<i64: 1, 8, 1>}, {pipeline_mode = #tpu.pipeline_mode<synchronous>, transform_indices = @transform_1, window_bounds = array<i64: 8, 4>}, {pipeline_mode = #tpu.pipeline_mode<synchronous>, transform_indices = @transform_2, window_bounds = array<i64: 1, 4>}, {pipeline_mode = #tpu.pipeline_mode<synchronous>, transform_indices = @transform_3, window_bounds = array<i64: 9, 4, 4>}, {transform_indices = @transform_4, window_bounds = array<i64: 1, 4, 128>}, {transform_indices = @transform_5, window_bounds = array<i64: 1, 1, 4, 32>}, {transform_indices = @transform_6, window_bounds = array<i64: 1, 1, 128>}, {transform_indices = @transform_7, window_bounds = array<i64: 1>}, {pipeline_mode = #tpu.pipeline_mode<synchronous>, transform_indices = @transform_8, window_bounds = array<i64: 4, 1>}, {transform_indices = @transform_9, window_bounds = array<i64: 1, 4, 128>}]} {
    %c0_i32 = arith.constant 0 : i32
    %0 = arith.cmpi eq, %arg1, %c0_i32 : i32
    %1 = arith.extui %0 : i1 to i32
    %c0_i32_0 = arith.constant 0 : i32
    %2 = arith.cmpi ne, %1, %c0_i32_0 : i32
    scf.if %2 {
      %c0_129 = arith.constant 0 : index
      %c0_130 = arith.constant 0 : index
      %177 = vector.load %arg3[%c0_129, %c0_130] : memref<8x4xf32, #tpu.memory_space<vmem>>, vector<8x4xf32>
      %c0_131 = arith.constant 0 : index
      %c0_132 = arith.constant 0 : index
      %c0_133 = arith.constant 0 : index
      %178 = vector.load %arg2[%c0_131, %c0_132, %c0_133] : memref<1x8x1xf32, #tpu.memory_space<vmem>>, vector<1x8x1xf32>
      %179 = vector.shape_cast %178 : vector<1x8x1xf32> to vector<8x1xf32>
      %180 = vector.broadcast %179 : vector<8x1xf32> to vector<8x4xf32>
      %181 = arith.mulf %177, %180 : vector<8x4xf32>
      %cst_134 = arith.constant dense<0.000000e+00> : vector<4xf32>
      %182 = vector.multi_reduction <add>, %181, %cst_134 [0] : vector<8x4xf32> to vector<4xf32>
      %183 = vector.shape_cast %182 : vector<4xf32> to vector<1x4xf32>
      %c0_135 = arith.constant 0 : index
      %c0_136 = arith.constant 0 : index
      %184 = vector.load %arg4[%c0_135, %c0_136] : memref<1x4xf32, #tpu.memory_space<vmem>>, vector<1x4xf32>
      %185 = arith.addf %183, %184 : vector<1x4xf32>
      %c0_137 = arith.constant 0 : index
      %c0_138 = arith.constant 0 : index
      %c0_139 = arith.constant 0 : index
      %186 = vector.load %arg5[%c0_137, %c0_138, %c0_139] : memref<9x4x4xbf16, #tpu.memory_space<vmem>>, vector<9x4x4xbf16>
      %187 = arith.extf %186 : vector<9x4x4xbf16> to vector<9x4x4xf32>
      %188 = vector.shape_cast %185 : vector<1x4xf32> to vector<1x1x4xf32>
      %189 = vector.broadcast %188 : vector<1x1x4xf32> to vector<9x4x4xf32>
      %190 = arith.mulf %187, %189 : vector<9x4x4xf32>
      %191 = arith.mulf %190, %190 : vector<9x4x4xf32>
      %cst_140 = arith.constant dense<0.000000e+00> : vector<4xf32>
      %192 = vector.multi_reduction <add>, %191, %cst_140 [0, 2] : vector<9x4x4xf32> to vector<4xf32>
      %193 = vector.shape_cast %192 : vector<4xf32> to vector<1x4x1xf32>
      %cst_141 = arith.constant 9.99999993E-9 : f32
      %194 = vector.broadcast %cst_141 : f32 to vector<1x4x1xf32>
      %195 = arith.addf %193, %194 : vector<1x4x1xf32>
      %196 = math.rsqrt %195 : vector<1x4x1xf32>
      %197 = vector.broadcast %196 : vector<1x4x1xf32> to vector<9x4x4xf32>
      %198 = arith.mulf %190, %197 : vector<9x4x4xf32>
      %199 = arith.truncf %198 : vector<9x4x4xf32> to vector<9x4x4xbf16>
      %c0_142 = arith.constant 0 : index
      %c0_143 = arith.constant 0 : index
      %c0_144 = arith.constant 0 : index
      %200 = vector.load %arg13[%c0_142, %c0_143, %c0_144] : memref<9x4x4xbf16, #tpu.memory_space<vmem>>, vector<9x4x4xbf16>
      tpu.vector_store %arg13[%c0_142, %c0_143, %c0_144], %199 {strides = array<i32>} : memref<9x4x4xbf16, #tpu.memory_space<vmem>>, vector<9x4x4xbf16>,
    } else {
    }
    %c0 = arith.constant 0 : index
    %c0_1 = arith.constant 0 : index
    %c0_2 = arith.constant 0 : index
    %3 = vector.load %arg6[%c0, %c0_1, %c0_2] : memref<1x4x128xbf16, #tpu.memory_space<vmem>>, vector<1x4x128xbf16>
    %4 = vector.shape_cast %3 : vector<1x4x128xbf16> to vector<4x128xbf16>
    %c0_3 = arith.constant 0 : index
    %c128 = arith.constant 128 : index
    %5 = vector.load %arg12[%c0_3, %c128] : memref<4x416xbf16, #tpu.memory_space<vmem>>, vector<4x128xbf16>
    tpu.vector_store %arg12[%c0_3, %c128], %4 {strides = array<i32>} : memref<4x416xbf16, #tpu.memory_space<vmem>>, vector<4x128xbf16>,
    %c0_4 = arith.constant 0 : index
    %c0_5 = arith.constant 0 : index
    %c0_6 = arith.constant 0 : index
    %c0_7 = arith.constant 0 : index
    %6 = vector.load %arg7[%c0_4, %c0_5, %c0_6, %c0_7] : memref<1x1x4x32xbf16, #tpu.memory_space<vmem>>, vector<1x1x4x32xbf16>
    %7 = vector.shape_cast %6 : vector<1x1x4x32xbf16> to vector<4x32xbf16>
    %c0_8 = arith.constant 0 : index
    %c256 = arith.constant 256 : index
    %8 = vector.load %arg12[%c0_8, %c256] : memref<4x416xbf16, #tpu.memory_space<vmem>>, vector<4x32xbf16>
    tpu.vector_store %arg12[%c0_8, %c256], %7 {strides = array<i32>} : memref<4x416xbf16, #tpu.memory_space<vmem>>, vector<4x32xbf16>,
    %9 = tpu.iota {dimensions = array<i32: 1>} : vector<1x128xi32>
    %c16_i32 = arith.constant 16 : i32
    %c0_i32_9 = arith.constant 0 : i32
    %10 = arith.cmpi eq, %c16_i32, %c0_i32_9 : i32
    %c1_i32 = arith.constant 1 : i32
    %11 = arith.select %10, %c1_i32, %c16_i32 : i32
    %12 = vector.broadcast %11 : i32 to vector<1x128xi32>
    %13 = arith.remsi %9, %12 : vector<1x128xi32>
    %c0_i32_10 = arith.constant 0 : i32
    %14 = vector.broadcast %c0_i32_10 : i32 to vector<1x128xi32>
    %15 = arith.cmpi ne, %13, %14 : vector<1x128xi32>
    %c0_i32_11 = arith.constant 0 : i32
    %16 = vector.broadcast %c0_i32_11 : i32 to vector<1x128xi32>
    %17 = arith.cmpi slt, %13, %16 : vector<1x128xi32>
    %c0_i32_12 = arith.constant 0 : i32
    %18 = arith.cmpi slt, %11, %c0_i32_12 : i32
    %19 = vector.broadcast %18 : i1 to vector<1x128xi1>
    %20 = vector.broadcast %19 : vector<1x128xi1> to vector<1x128xi1>
    %21 = arith.xori %17, %20 : vector<1x128xi1>
    %22 = arith.andi %21, %15 : vector<1x128xi1>
    %23 = vector.broadcast %11 : i32 to vector<1x128xi32>
    %24 = arith.addi %13, %23 : vector<1x128xi32>
    %25 = arith.select %22, %24, %13 : vector<1x128xi1>, vector<1x128xi32>
    %c-1_i32 = arith.constant -1 : i32
    %26 = vector.broadcast %c-1_i32 : i32 to vector<1x128xi32>
    %27 = arith.addi %25, %26 : vector<1x128xi32>
    %c0_i32_13 = arith.constant 0 : i32
    %28 = vector.broadcast %c0_i32_13 : i32 to vector<1x128xi32>
    %29 = arith.cmpi sge, %27, %28 : vector<1x128xi32>
    %c-1_i32_14 = arith.constant -1 : i32
    %30 = vector.broadcast %c-1_i32_14 : i32 to vector<1x128xi32>
    %31 = arith.addi %25, %30 : vector<1x128xi32>
    %c16_i32_15 = arith.constant 16 : i32
    %32 = vector.broadcast %c16_i32_15 : i32 to vector<1x128xi32>
    %33 = arith.cmpi slt, %31, %32 : vector<1x128xi32>
    %34 = arith.andi %29, %33 : vector<1x128xi1>
    %c1_i32_16 = arith.constant 1 : i32
    %35 = vector.broadcast %c1_i32_16 : i32 to vector<1x128xi32>
    %36 = arith.addi %25, %35 : vector<1x128xi32>
    %c0_i32_17 = arith.constant 0 : i32
    %37 = vector.broadcast %c0_i32_17 : i32 to vector<1x128xi32>
    %38 = arith.cmpi sge, %36, %37 : vector<1x128xi32>
    %c1_i32_18 = arith.constant 1 : i32
    %39 = vector.broadcast %c1_i32_18 : i32 to vector<1x128xi32>
    %40 = arith.addi %25, %39 : vector<1x128xi32>
    %c16_i32_19 = arith.constant 16 : i32
    %41 = vector.broadcast %c16_i32_19 : i32 to vector<1x128xi32>
    %42 = arith.cmpi slt, %40, %41 : vector<1x128xi32>
    %43 = arith.andi %38, %42 : vector<1x128xi1>
    %c0_20 = arith.constant 0 : index
    %c127 = arith.constant 127 : index
    %44 = vector.load %arg12[%c0_20, %c127] : memref<4x416xbf16, #tpu.memory_space<vmem>>, vector<4x128xbf16>
    %cst = arith.constant 0.000000e+00 : bf16
    %45 = vector.shape_cast %34 : vector<1x128xi1> to vector<1x128xi1>
    %46 = vector.broadcast %45 : vector<1x128xi1> to vector<4x128xi1>
    %47 = vector.broadcast %cst : bf16 to vector<4x128xbf16>
    %48 = arith.select %46, %44, %47 : vector<4x128xi1>, vector<4x128xbf16>
    %c0_21 = arith.constant 0 : index
    %c0_22 = arith.constant 0 : index
    %c0_23 = arith.constant 0 : index
    %49 = vector.load %arg13[%c0_21, %c0_22, %c0_23] : memref<9x4x4xbf16, #tpu.memory_space<vmem>>, vector<1x4x4xbf16>
    %50 = vector.shape_cast %49 : vector<1x4x4xbf16> to vector<4x4xbf16>
    %cst_24 = arith.constant dense<0.000000e+00> : vector<4x128xf32>
    %51 = tpu.matmul %50, %48, %cst_24 {dimension_numbers = #tpu.dot_dimension_numbers<[1], [0], [0], [1], [0, 0, 1, 1], [], []>} : vector<4x4xbf16>, vector<4x128xbf16>, vector<4x128xf32> -> vector<4x128xf32>
    %c0_25 = arith.constant 0 : index
    %c0_26 = arith.constant 0 : index
    %c0_27 = arith.constant 0 : index
    %52 = vector.load %arg11[%c0_25, %c0_26, %c0_27] : memref<1x4x128xf32, #tpu.memory_space<vmem>>, vector<1x4x128xf32>
    %53 = vector.shape_cast %52 : vector<1x4x128xf32> to vector<4x128xf32>
    %54 = vector.shape_cast %51 : vector<4x128xf32> to vector<1x4x128xf32>
    tpu.vector_store %arg11[%c0_25, %c0_26, %c0_27], %54 {strides = array<i32>} : memref<1x4x128xf32, #tpu.memory_space<vmem>>, vector<1x4x128xf32>,
    %c0_28 = arith.constant 0 : index
    %c128_29 = arith.constant 128 : index
    %55 = vector.load %arg12[%c0_28, %c128_29] : memref<4x416xbf16, #tpu.memory_space<vmem>>, vector<4x128xbf16>
    %c1 = arith.constant 1 : index
    %c0_30 = arith.constant 0 : index
    %c0_31 = arith.constant 0 : index
    %56 = vector.load %arg13[%c1, %c0_30, %c0_31] : memref<9x4x4xbf16, #tpu.memory_space<vmem>>, vector<1x4x4xbf16>
    %57 = vector.shape_cast %56 : vector<1x4x4xbf16> to vector<4x4xbf16>
    %cst_32 = arith.constant dense<0.000000e+00> : vector<4x128xf32>
    %58 = tpu.matmul %57, %55, %cst_32 {dimension_numbers = #tpu.dot_dimension_numbers<[1], [0], [0], [1], [0, 0, 1, 1], [], []>} : vector<4x4xbf16>, vector<4x128xbf16>, vector<4x128xf32> -> vector<4x128xf32>
    %c0_33 = arith.constant 0 : index
    %c0_34 = arith.constant 0 : index
    %c0_35 = arith.constant 0 : index
    %59 = vector.load %arg11[%c0_33, %c0_34, %c0_35] : memref<1x4x128xf32, #tpu.memory_space<vmem>>, vector<1x4x128xf32>
    %60 = vector.shape_cast %59 : vector<1x4x128xf32> to vector<4x128xf32>
    %61 = arith.addf %60, %58 : vector<4x128xf32>
    %c0_36 = arith.constant 0 : index
    %c0_37 = arith.constant 0 : index
    %c0_38 = arith.constant 0 : index
    %62 = vector.load %arg11[%c0_36, %c0_37, %c0_38] : memref<1x4x128xf32, #tpu.memory_space<vmem>>, vector<1x4x128xf32>
    %63 = vector.shape_cast %62 : vector<1x4x128xf32> to vector<4x128xf32>
    %64 = vector.shape_cast %61 : vector<4x128xf32> to vector<1x4x128xf32>
    tpu.vector_store %arg11[%c0_36, %c0_37, %c0_38], %64 {strides = array<i32>} : memref<1x4x128xf32, #tpu.memory_space<vmem>>, vector<1x4x128xf32>,
    %c0_39 = arith.constant 0 : index
    %c129 = arith.constant 129 : index
    %65 = vector.load %arg12[%c0_39, %c129] : memref<4x416xbf16, #tpu.memory_space<vmem>>, vector<4x128xbf16>
    %cst_40 = arith.constant 0.000000e+00 : bf16
    %66 = vector.shape_cast %43 : vector<1x128xi1> to vector<1x128xi1>
    %67 = vector.broadcast %66 : vector<1x128xi1> to vector<4x128xi1>
    %68 = vector.broadcast %cst_40 : bf16 to vector<4x128xbf16>
    %69 = arith.select %67, %65, %68 : vector<4x128xi1>, vector<4x128xbf16>
    %c2 = arith.constant 2 : index
    %c0_41 = arith.constant 0 : index
    %c0_42 = arith.constant 0 : index
    %70 = vector.load %arg13[%c2, %c0_41, %c0_42] : memref<9x4x4xbf16, #tpu.memory_space<vmem>>, vector<1x4x4xbf16>
    %71 = vector.shape_cast %70 : vector<1x4x4xbf16> to vector<4x4xbf16>
    %cst_43 = arith.constant dense<0.000000e+00> : vector<4x128xf32>
    %72 = tpu.matmul %71, %69, %cst_43 {dimension_numbers = #tpu.dot_dimension_numbers<[1], [0], [0], [1], [0, 0, 1, 1], [], []>} : vector<4x4xbf16>, vector<4x128xbf16>, vector<4x128xf32> -> vector<4x128xf32>
    %c0_44 = arith.constant 0 : index
    %c0_45 = arith.constant 0 : index
    %c0_46 = arith.constant 0 : index
    %73 = vector.load %arg11[%c0_44, %c0_45, %c0_46] : memref<1x4x128xf32, #tpu.memory_space<vmem>>, vector<1x4x128xf32>
    %74 = vector.shape_cast %73 : vector<1x4x128xf32> to vector<4x128xf32>
    %75 = arith.addf %74, %72 : vector<4x128xf32>
    %c0_47 = arith.constant 0 : index
    %c0_48 = arith.constant 0 : index
    %c0_49 = arith.constant 0 : index
    %76 = vector.load %arg11[%c0_47, %c0_48, %c0_49] : memref<1x4x128xf32, #tpu.memory_space<vmem>>, vector<1x4x128xf32>
    %77 = vector.shape_cast %76 : vector<1x4x128xf32> to vector<4x128xf32>
    %78 = vector.shape_cast %75 : vector<4x128xf32> to vector<1x4x128xf32>
    tpu.vector_store %arg11[%c0_47, %c0_48, %c0_49], %78 {strides = array<i32>} : memref<1x4x128xf32, #tpu.memory_space<vmem>>, vector<1x4x128xf32>,
    %c0_50 = arith.constant 0 : index
    %c143 = arith.constant 143 : index
    %79 = vector.load %arg12[%c0_50, %c143] : memref<4x416xbf16, #tpu.memory_space<vmem>>, vector<4x128xbf16>
    %cst_51 = arith.constant 0.000000e+00 : bf16
    %80 = vector.shape_cast %34 : vector<1x128xi1> to vector<1x128xi1>
    %81 = vector.broadcast %80 : vector<1x128xi1> to vector<4x128xi1>
    %82 = vector.broadcast %cst_51 : bf16 to vector<4x128xbf16>
    %83 = arith.select %81, %79, %82 : vector<4x128xi1>, vector<4x128xbf16>
    %c3 = arith.constant 3 : index
    %c0_52 = arith.constant 0 : index
    %c0_53 = arith.constant 0 : index
    %84 = vector.load %arg13[%c3, %c0_52, %c0_53] : memref<9x4x4xbf16, #tpu.memory_space<vmem>>, vector<1x4x4xbf16>
    %85 = vector.shape_cast %84 : vector<1x4x4xbf16> to vector<4x4xbf16>
    %cst_54 = arith.constant dense<0.000000e+00> : vector<4x128xf32>
    %86 = tpu.matmul %85, %83, %cst_54 {dimension_numbers = #tpu.dot_dimension_numbers<[1], [0], [0], [1], [0, 0, 1, 1], [], []>} : vector<4x4xbf16>, vector<4x128xbf16>, vector<4x128xf32> -> vector<4x128xf32>
    %c0_55 = arith.constant 0 : index
    %c0_56 = arith.constant 0 : index
    %c0_57 = arith.constant 0 : index
    %87 = vector.load %arg11[%c0_55, %c0_56, %c0_57] : memref<1x4x128xf32, #tpu.memory_space<vmem>>, vector<1x4x128xf32>
    %88 = vector.shape_cast %87 : vector<1x4x128xf32> to vector<4x128xf32>
    %89 = arith.addf %88, %86 : vector<4x128xf32>
    %c0_58 = arith.constant 0 : index
    %c0_59 = arith.constant 0 : index
    %c0_60 = arith.constant 0 : index
    %90 = vector.load %arg11[%c0_58, %c0_59, %c0_60] : memref<1x4x128xf32, #tpu.memory_space<vmem>>, vector<1x4x128xf32>
    %91 = vector.shape_cast %90 : vector<1x4x128xf32> to vector<4x128xf32>
    %92 = vector.shape_cast %89 : vector<4x128xf32> to vector<1x4x128xf32>
    tpu.vector_store %arg11[%c0_58, %c0_59, %c0_60], %92 {strides = array<i32>} : memref<1x4x128xf32, #tpu.memory_space<vmem>>, vector<1x4x128xf32>,
    %c0_61 = arith.constant 0 : index
    %c144 = arith.constant 144 : index
    %93 = vector.load %arg12[%c0_61, %c144] : memref<4x416xbf16, #tpu.memory_space<vmem>>, vector<4x128xbf16>
    %c4 = arith.constant 4 : index
    %c0_62 = arith.constant 0 : index
    %c0_63 = arith.constant 0 : index
    %94 = vector.load %arg13[%c4, %c0_62, %c0_63] : memref<9x4x4xbf16, #tpu.memory_space<vmem>>, vector<1x4x4xbf16>
    %95 = vector.shape_cast %94 : vector<1x4x4xbf16> to vector<4x4xbf16>
    %cst_64 = arith.constant dense<0.000000e+00> : vector<4x128xf32>
    %96 = tpu.matmul %95, %93, %cst_64 {dimension_numbers = #tpu.dot_dimension_numbers<[1], [0], [0], [1], [0, 0, 1, 1], [], []>} : vector<4x4xbf16>, vector<4x128xbf16>, vector<4x128xf32> -> vector<4x128xf32>
    %c0_65 = arith.constant 0 : index
    %c0_66 = arith.constant 0 : index
    %c0_67 = arith.constant 0 : index
    %97 = vector.load %arg11[%c0_65, %c0_66, %c0_67] : memref<1x4x128xf32, #tpu.memory_space<vmem>>, vector<1x4x128xf32>
    %98 = vector.shape_cast %97 : vector<1x4x128xf32> to vector<4x128xf32>
    %99 = arith.addf %98, %96 : vector<4x128xf32>
    %c0_68 = arith.constant 0 : index
    %c0_69 = arith.constant 0 : index
    %c0_70 = arith.constant 0 : index
    %100 = vector.load %arg11[%c0_68, %c0_69, %c0_70] : memref<1x4x128xf32, #tpu.memory_space<vmem>>, vector<1x4x128xf32>
    %101 = vector.shape_cast %100 : vector<1x4x128xf32> to vector<4x128xf32>
    %102 = vector.shape_cast %99 : vector<4x128xf32> to vector<1x4x128xf32>
    tpu.vector_store %arg11[%c0_68, %c0_69, %c0_70], %102 {strides = array<i32>} : memref<1x4x128xf32, #tpu.memory_space<vmem>>, vector<1x4x128xf32>,
    %c0_71 = arith.constant 0 : index
    %c145 = arith.constant 145 : index
    %103 = vector.load %arg12[%c0_71, %c145] : memref<4x416xbf16, #tpu.memory_space<vmem>>, vector<4x128xbf16>
    %cst_72 = arith.constant 0.000000e+00 : bf16
    %104 = vector.shape_cast %43 : vector<1x128xi1> to vector<1x128xi1>
    %105 = vector.broadcast %104 : vector<1x128xi1> to vector<4x128xi1>
    %106 = vector.broadcast %cst_72 : bf16 to vector<4x128xbf16>
    %107 = arith.select %105, %103, %106 : vector<4x128xi1>, vector<4x128xbf16>
    %c5 = arith.constant 5 : index
    %c0_73 = arith.constant 0 : index
    %c0_74 = arith.constant 0 : index
    %108 = vector.load %arg13[%c5, %c0_73, %c0_74] : memref<9x4x4xbf16, #tpu.memory_space<vmem>>, vector<1x4x4xbf16>
    %109 = vector.shape_cast %108 : vector<1x4x4xbf16> to vector<4x4xbf16>
    %cst_75 = arith.constant dense<0.000000e+00> : vector<4x128xf32>
    %110 = tpu.matmul %109, %107, %cst_75 {dimension_numbers = #tpu.dot_dimension_numbers<[1], [0], [0], [1], [0, 0, 1, 1], [], []>} : vector<4x4xbf16>, vector<4x128xbf16>, vector<4x128xf32> -> vector<4x128xf32>
    %c0_76 = arith.constant 0 : index
    %c0_77 = arith.constant 0 : index
    %c0_78 = arith.constant 0 : index
    %111 = vector.load %arg11[%c0_76, %c0_77, %c0_78] : memref<1x4x128xf32, #tpu.memory_space<vmem>>, vector<1x4x128xf32>
    %112 = vector.shape_cast %111 : vector<1x4x128xf32> to vector<4x128xf32>
    %113 = arith.addf %112, %110 : vector<4x128xf32>
    %c0_79 = arith.constant 0 : index
    %c0_80 = arith.constant 0 : index
    %c0_81 = arith.constant 0 : index
    %114 = vector.load %arg11[%c0_79, %c0_80, %c0_81] : memref<1x4x128xf32, #tpu.memory_space<vmem>>, vector<1x4x128xf32>
    %115 = vector.shape_cast %114 : vector<1x4x128xf32> to vector<4x128xf32>
    %116 = vector.shape_cast %113 : vector<4x128xf32> to vector<1x4x128xf32>
    tpu.vector_store %arg11[%c0_79, %c0_80, %c0_81], %116 {strides = array<i32>} : memref<1x4x128xf32, #tpu.memory_space<vmem>>, vector<1x4x128xf32>,
    %c0_82 = arith.constant 0 : index
    %c159 = arith.constant 159 : index
    %117 = vector.load %arg12[%c0_82, %c159] : memref<4x416xbf16, #tpu.memory_space<vmem>>, vector<4x128xbf16>
    %cst_83 = arith.constant 0.000000e+00 : bf16
    %118 = vector.shape_cast %34 : vector<1x128xi1> to vector<1x128xi1>
    %119 = vector.broadcast %118 : vector<1x128xi1> to vector<4x128xi1>
    %120 = vector.broadcast %cst_83 : bf16 to vector<4x128xbf16>
    %121 = arith.select %119, %117, %120 : vector<4x128xi1>, vector<4x128xbf16>
    %c6 = arith.constant 6 : index
    %c0_84 = arith.constant 0 : index
    %c0_85 = arith.constant 0 : index
    %122 = vector.load %arg13[%c6, %c0_84, %c0_85] : memref<9x4x4xbf16, #tpu.memory_space<vmem>>, vector<1x4x4xbf16>
    %123 = vector.shape_cast %122 : vector<1x4x4xbf16> to vector<4x4xbf16>
    %cst_86 = arith.constant dense<0.000000e+00> : vector<4x128xf32>
    %124 = tpu.matmul %123, %121, %cst_86 {dimension_numbers = #tpu.dot_dimension_numbers<[1], [0], [0], [1], [0, 0, 1, 1], [], []>} : vector<4x4xbf16>, vector<4x128xbf16>, vector<4x128xf32> -> vector<4x128xf32>
    %c0_87 = arith.constant 0 : index
    %c0_88 = arith.constant 0 : index
    %c0_89 = arith.constant 0 : index
    %125 = vector.load %arg11[%c0_87, %c0_88, %c0_89] : memref<1x4x128xf32, #tpu.memory_space<vmem>>, vector<1x4x128xf32>
    %126 = vector.shape_cast %125 : vector<1x4x128xf32> to vector<4x128xf32>
    %127 = arith.addf %126, %124 : vector<4x128xf32>
    %c0_90 = arith.constant 0 : index
    %c0_91 = arith.constant 0 : index
    %c0_92 = arith.constant 0 : index
    %128 = vector.load %arg11[%c0_90, %c0_91, %c0_92] : memref<1x4x128xf32, #tpu.memory_space<vmem>>, vector<1x4x128xf32>
    %129 = vector.shape_cast %128 : vector<1x4x128xf32> to vector<4x128xf32>
    %130 = vector.shape_cast %127 : vector<4x128xf32> to vector<1x4x128xf32>
    tpu.vector_store %arg11[%c0_90, %c0_91, %c0_92], %130 {strides = array<i32>} : memref<1x4x128xf32, #tpu.memory_space<vmem>>, vector<1x4x128xf32>,
    %c0_93 = arith.constant 0 : index
    %c160 = arith.constant 160 : index
    %131 = vector.load %arg12[%c0_93, %c160] : memref<4x416xbf16, #tpu.memory_space<vmem>>, vector<4x128xbf16>
    %c7 = arith.constant 7 : index
    %c0_94 = arith.constant 0 : index
    %c0_95 = arith.constant 0 : index
    %132 = vector.load %arg13[%c7, %c0_94, %c0_95] : memref<9x4x4xbf16, #tpu.memory_space<vmem>>, vector<1x4x4xbf16>
    %133 = vector.shape_cast %132 : vector<1x4x4xbf16> to vector<4x4xbf16>
    %cst_96 = arith.constant dense<0.000000e+00> : vector<4x128xf32>
    %134 = tpu.matmul %133, %131, %cst_96 {dimension_numbers = #tpu.dot_dimension_numbers<[1], [0], [0], [1], [0, 0, 1, 1], [], []>} : vector<4x4xbf16>, vector<4x128xbf16>, vector<4x128xf32> -> vector<4x128xf32>
    %c0_97 = arith.constant 0 : index
    %c0_98 = arith.constant 0 : index
    %c0_99 = arith.constant 0 : index
    %135 = vector.load %arg11[%c0_97, %c0_98, %c0_99] : memref<1x4x128xf32, #tpu.memory_space<vmem>>, vector<1x4x128xf32>
    %136 = vector.shape_cast %135 : vector<1x4x128xf32> to vector<4x128xf32>
    %137 = arith.addf %136, %134 : vector<4x128xf32>
    %c0_100 = arith.constant 0 : index
    %c0_101 = arith.constant 0 : index
    %c0_102 = arith.constant 0 : index
    %138 = vector.load %arg11[%c0_100, %c0_101, %c0_102] : memref<1x4x128xf32, #tpu.memory_space<vmem>>, vector<1x4x128xf32>
    %139 = vector.shape_cast %138 : vector<1x4x128xf32> to vector<4x128xf32>
    %140 = vector.shape_cast %137 : vector<4x128xf32> to vector<1x4x128xf32>
    tpu.vector_store %arg11[%c0_100, %c0_101, %c0_102], %140 {strides = array<i32>} : memref<1x4x128xf32, #tpu.memory_space<vmem>>, vector<1x4x128xf32>,
    %c0_103 = arith.constant 0 : index
    %c161 = arith.constant 161 : index
    %141 = vector.load %arg12[%c0_103, %c161] : memref<4x416xbf16, #tpu.memory_space<vmem>>, vector<4x128xbf16>
    %cst_104 = arith.constant 0.000000e+00 : bf16
    %142 = vector.shape_cast %43 : vector<1x128xi1> to vector<1x128xi1>
    %143 = vector.broadcast %142 : vector<1x128xi1> to vector<4x128xi1>
    %144 = vector.broadcast %cst_104 : bf16 to vector<4x128xbf16>
    %145 = arith.select %143, %141, %144 : vector<4x128xi1>, vector<4x128xbf16>
    %c8 = arith.constant 8 : index
    %c0_105 = arith.constant 0 : index
    %c0_106 = arith.constant 0 : index
    %146 = vector.load %arg13[%c8, %c0_105, %c0_106] : memref<9x4x4xbf16, #tpu.memory_space<vmem>>, vector<1x4x4xbf16>
    %147 = vector.shape_cast %146 : vector<1x4x4xbf16> to vector<4x4xbf16>
    %cst_107 = arith.constant dense<0.000000e+00> : vector<4x128xf32>
    %148 = tpu.matmul %147, %145, %cst_107 {dimension_numbers = #tpu.dot_dimension_numbers<[1], [0], [0], [1], [0, 0, 1, 1], [], []>} : vector<4x4xbf16>, vector<4x128xbf16>, vector<4x128xf32> -> vector<4x128xf32>
    %c0_108 = arith.constant 0 : index
    %c0_109 = arith.constant 0 : index
    %c0_110 = arith.constant 0 : index
    %149 = vector.load %arg11[%c0_108, %c0_109, %c0_110] : memref<1x4x128xf32, #tpu.memory_space<vmem>>, vector<1x4x128xf32>
    %150 = vector.shape_cast %149 : vector<1x4x128xf32> to vector<4x128xf32>
    %151 = arith.addf %150, %148 : vector<4x128xf32>
    %c0_111 = arith.constant 0 : index
    %c0_112 = arith.constant 0 : index
    %c0_113 = arith.constant 0 : index
    %152 = vector.load %arg11[%c0_111, %c0_112, %c0_113] : memref<1x4x128xf32, #tpu.memory_space<vmem>>, vector<1x4x128xf32>
    %153 = vector.shape_cast %152 : vector<1x4x128xf32> to vector<4x128xf32>
    %154 = vector.shape_cast %151 : vector<4x128xf32> to vector<1x4x128xf32>
    tpu.vector_store %arg11[%c0_111, %c0_112, %c0_113], %154 {strides = array<i32>} : memref<1x4x128xf32, #tpu.memory_space<vmem>>, vector<1x4x128xf32>,
    %c0_114 = arith.constant 0 : index
    %c0_115 = arith.constant 0 : index
    %c0_116 = arith.constant 0 : index
    %155 = vector.load %arg11[%c0_114, %c0_115, %c0_116] : memref<1x4x128xf32, #tpu.memory_space<vmem>>, vector<1x4x128xf32>
    %156 = vector.shape_cast %155 : vector<1x4x128xf32> to vector<4x128xf32>
    %c0_117 = arith.constant 0 : index
    %157 = memref.load %arg9[%c0_117] : memref<1xf32, #tpu.memory_space<smem>>
    %c0_118 = arith.constant 0 : index
    %c0_119 = arith.constant 0 : index
    %c0_120 = arith.constant 0 : index
    %158 = vector.load %arg8[%c0_118, %c0_119, %c0_120] : memref<1x1x128xf32, #tpu.memory_space<vmem>>, vector<1x1x128xf32>
    %159 = vector.shape_cast %158 : vector<1x1x128xf32> to vector<1x128xf32>
    %160 = vector.broadcast %157 : f32 to vector<1x128xf32>
    %161 = arith.mulf %160, %159 : vector<1x128xf32>
    %162 = vector.broadcast %161 : vector<1x128xf32> to vector<4x128xf32>
    %163 = arith.addf %156, %162 : vector<4x128xf32>
    %c0_121 = arith.constant 0 : index
    %c0_122 = arith.constant 0 : index
    %164 = vector.load %arg10[%c0_121, %c0_122] : memref<4x1xf32, #tpu.memory_space<vmem>>, vector<4x1xf32>
    %165 = vector.broadcast %164 : vector<4x1xf32> to vector<4x128xf32>
    %166 = arith.addf %163, %165 : vector<4x128xf32>
    %cst_123 = arith.constant 0.000000e+00 : f32
    %167 = vector.broadcast %cst_123 : f32 to vector<4x128xf32>
    %168 = arith.cmpf oge, %166, %167 : vector<4x128xf32>
    %cst_124 = arith.constant 2.000000e-01 : f32
    %169 = vector.broadcast %cst_124 : f32 to vector<4x128xf32>
    %170 = arith.mulf %169, %166 : vector<4x128xf32>
    %171 = arith.select %168, %166, %170 : vector<4x128xi1>, vector<4x128xf32>
    %cst_125 = arith.constant 1.41421354 : f32
    %172 = vector.broadcast %cst_125 : f32 to vector<4x128xf32>
    %173 = arith.mulf %171, %172 : vector<4x128xf32>
    %c0_126 = arith.constant 0 : index
    %c0_127 = arith.constant 0 : index
    %c0_128 = arith.constant 0 : index
    %174 = vector.load %arg11[%c0_126, %c0_127, %c0_128] : memref<1x4x128xf32, #tpu.memory_space<vmem>>, vector<1x4x128xf32>
    %175 = vector.shape_cast %174 : vector<1x4x128xf32> to vector<4x128xf32>
    %176 = vector.shape_cast %173 : vector<4x128xf32> to vector<1x4x128xf32>
    tpu.vector_store %arg11[%c0_126, %c0_127, %c0_128], %176 {strides = array<i32>} : memref<1x4x128xf32, #tpu.memory_space<vmem>>, vector<1x4x128xf32>,
    return
  }
  func.func @transform_0(%arg0: i32, %arg1: i32) -> (i32, i32, i32) {
    %c0_i32 = arith.constant 0 : i32
    %c0_i32_0 = arith.constant 0 : i32
    %c0_i32_1 = arith.constant 0 : i32
    return %arg0, %c0_i32, %c0_i32_0 : i32, i32, i32
  }
  func.func @transform_1(%arg0: i32, %arg1: i32) -> (i32, i32) {
    %c0_i32 = arith.constant 0 : i32
    %c0_i32_0 = arith.constant 0 : i32
    %c0_i32_1 = arith.constant 0 : i32
    return %c0_i32, %c0_i32_0 : i32, i32
  }
  func.func @transform_2(%arg0: i32, %arg1: i32) -> (i32, i32) {
    %c0_i32 = arith.constant 0 : i32
    %c0_i32_0 = arith.constant 0 : i32
    %c0_i32_1 = arith.constant 0 : i32
    return %c0_i32, %c0_i32_0 : i32, i32
  }
  func.func @transform_3(%arg0: i32, %arg1: i32) -> (i32, i32, i32) {
    %c0_i32 = arith.constant 0 : i32
    %c0_i32_0 = arith.constant 0 : i32
    %c0_i32_1 = arith.constant 0 : i32
    %c0_i32_2 = arith.constant 0 : i32
    return %c0_i32, %c0_i32_0, %c0_i32_1 : i32, i32, i32
  }
  func.func @transform_4(%arg0: i32, %arg1: i32) -> (i32, i32, i32) {
    %c0_i32 = arith.constant 0 : i32
    %c0_i32_0 = arith.constant 0 : i32
    return %arg0, %c0_i32, %arg1 : i32, i32, i32
  }
  func.func @transform_5(%arg0: i32, %arg1: i32) -> (i32, i32, i32, i32) {
    %c0_i32 = arith.constant 0 : i32
    %c0_i32_0 = arith.constant 0 : i32
    %c0_i32_1 = arith.constant 0 : i32
    return %arg0, %arg1, %c0_i32, %c0_i32_0 : i32, i32, i32, i32
  }
  func.func @transform_6(%arg0: i32, %arg1: i32) -> (i32, i32, i32) {
    %c0_i32 = arith.constant 0 : i32
    %c0_i32_0 = arith.constant 0 : i32
    return %arg0, %c0_i32, %arg1 : i32, i32, i32
  }
  func.func @transform_7(%arg0: i32, %arg1: i32) -> i32 {
    %c0_i32 = arith.constant 0 : i32
    %c0_i32_0 = arith.constant 0 : i32
    return %c0_i32 : i32
  }
  func.func @transform_8(%arg0: i32, %arg1: i32) -> (i32, i32) {
    %c0_i32 = arith.constant 0 : i32
    %c0_i32_0 = arith.constant 0 : i32
    %c0_i32_1 = arith.constant 0 : i32
    return %c0_i32, %c0_i32_0 : i32, i32
  }
  func.func @transform_9(%arg0: i32, %arg1: i32) -> (i32, i32, i32) {
    %c0_i32 = arith.constant 0 : i32
    %c0_i32_0 = arith.constant 0 : i32
    return %arg0, %c0_i32, %arg1 : i32, i32, i32
  }
}

</mosaic_0001>

<bundles_post_ra>
// kernel: tpu_custom_call.1
= control target key start
LH: loop header
LB: loop body
LE: loop exit
PB: predicated region body
PF: predicated region fallthrough
CT: control target
= control target key end

     0   :  { %s1735_s0 = inlined_call_operand.vmem [shape: f32[2,8,1], index: 0, kind: input, shape index: {}]   ;;  %s1736_s1 = inlined_call_operand.vmem [shape: f32[8,4], index: 1, kind: input, shape index: {}]   ;;  %s1737_s2 = inlined_call_operand.vmem [shape: f32[1,4], index: 2, kind: input, shape index: {}]   ;;  %s1738_s3 = inlined_call_operand.vmem [shape: bf16[9,4,4], index: 3, kind: input, shape index: {}]   ;;  %s1739_s4 = inlined_call_operand.vmem [shape: bf16[2,4,288], index: 4, kind: input, shape index: {}]   ;;  %s1740_s5 = inlined_call_operand.vmem [shape: bf16[2,2,4,32], index: 5, kind: input, shape index: {}]   ;;  %s1741_s6 = inlined_call_operand.vmem [shape: f32[2,1,256], index: 6, kind: input, shape index: {}]   ;;  %s1742_s7 = inlined_call_operand.<no memory space> [shape: f32[1], index: 7, kind: input, shape index: {}]   ;;  %s1743_s8 = inlined_call_operand.vmem [shape: f32[4,1], index: 8, kind: input, shape index: {}]   ;;  %s1744_s9 = inlined_call_operand.hbm [shape: f32[2,4,256], index: 9, kind: output, shape index: {}]  }
   0x1   :  { %14 = sst [smem:[#allocation4]] %s1742_s7 }
   0x2   :  { %15 = vsyncpa [#allocation6], 0 }
   0x3   :  { %17 = vsyncpa [#allocation6 + $0x1], 0  ;;  %s1447_s11 = smov 0   ;;  %s1449_s12 = smov 0  }
   0x4   :  { %s1451_s13 = smov 0   ;;  %s1453_s14 = smov 0  }
   0x5   :  { %s1455_s15 = smov 0   ;;  %s1457_s16 = smov 0  }
   0x6   :  { %s1459_s17 = smov 0   ;;  %s1461_s18 = smov 0  }
   0x7 LB: > { %1757 = sst [smem:[#allocation8_spill]] %s1350_s11  ;;  %s1163_s7 = sadd.s32 4294967295, %s1378_s18   ;;  %s1378_s18 = sphi %s1461_s18, %s23_s18   ;;  %s1374_s17 = sphi %s1459_s17, %s1781_s17   ;;  %s1370_s16 = sphi %s1457_s16, %s1780_s16   ;;  %s1366_s15 = sphi %s1455_s15, %s1779_s15   ;;  %s1362_s14 = sphi %s1453_s14, %s1778_s14   ;;  %s1358_s13 = sphi %s1451_s13, %s1777_s13   ;;  %s1354_s12 = sphi %s1449_s12, %s1783_s12   ;;  %s1350_s11 = sphi %s1447_s11, %s1782_s11  }
   0x8   : > { %1758 = sst [smem:[#allocation9_spill]] %s1358_s13  ;;  %s1164_s19 = sadd.s32 4294967294, %s1378_s18  }
   0x9   : > { %1759 = sst [smem:[#allocation10_spill]] %s1370_s16  ;;  %s32_s20 = sadd.s32 1, %s1370_s16 }
   0xa   : > { %1760 = sst [smem:[#allocation11_spill]] %s1374_s17  ;;  %p33_p0 = scmp.ge.s32.totalorder %s32_s20, 2 }
   0xb   : > { %1761 = sst [smem:[#allocation12_spill]] %s1378_s18  ;;  %s35_s21 = sadd.s32 1, %s1374_s17 }
   0xc   : > { %p269_p1 = scmp.ne.s32.totalorder %s1358_s13, %s1354_s12  ;;  %p270_p2 = scmp.eq.s32.totalorder %s1163_s7, 3 }
   0xd   : > { %s1785_s20 = smov (%p33_p0, %s32_s20), 0  ;;  %s1787_s21 = smov (!%p33_p0, %s35_s21), %s1374_s17 }
   0xe   : > { %1762 = sst [smem:[#allocation13_spill]] %s1785_s20  ;;  %s255_s22 = ssub.s32 %s1370_s16, %s1785_s20 }
   0xf   : > { %p1498_p3 = por %p270_p2, %p269_p1  ;;  %p37_p4 = scmp.ge.s32.totalorder %s1787_s21, 2 }
  0x10   : > { %p275_p5 = scmp.ne.s32.totalorder %s1354_s12, %s1350_s11  ;;  %p276_p6 = scmp.eq.s32.totalorder %s1164_s19, 3 }
  0x11   : > { %s1763_s23 = scalar_select %p1498_p3, 1, 0 }
  0x12   : > { %p1167_p7 = scmp.ge.s32.totalorder %s1378_s18, 1  ;;  %s1789_s21 = smov (%p37_p4, %s1787_s21), 0 }
  0x13   : > { %1764 = sst [smem:[#allocation14_spill]] %s1763_s23  ;;  %p1507_p8 = por %p276_p6, %p275_p5 }
  0x14   : > { %1765 = sst [smem:[#allocation15_spill]] %s1789_s21  ;;  %p348_p9 = scmp.lt.s32.totalorder %s1378_s18, 5 }
  0x15   : > { %s1766_s24 = scalar_select %p1507_p8, 1, 0 }
  0x16   : > { %s254_s25 = ssub.s32 %s1374_s17, %s1789_s21  ;;  %s259_s26 = sadd.s32 1, %s1358_s13 }
  0x17   : > { %1767 = sst [smem:[#allocation16_spill]] %s1766_s24  ;;  %s256_s27 = sor.u32 %s255_s22, %s254_s25 }
  0x18   : > { %p349_p10 = pnand %p1167_p7, %p348_p9  ;;  %p257_p11 = scmp.eq.s32.totalorder %s256_s27, 0 }
  0x19   : > { %s1751_s29 = sand.u32 (!%p349_p10), 1, %s1354_s12   ;;  %p406_p12 = scmp.lt.s32.totalorder (!%p349_p10), %s1366_s15, 1 }
  0x1a   : > { %s1516_s28 = scalar_select %p257_p11, %s1358_s13, %s259_s26  }
  0x1b   : > { %352 = sbr.rel (%p349_p10) target bundleno = 889 (0x379), region = 56  ;;  %s1168_s30 = sshll.u32 (!%p349_p10), %s1751_s29, 2 }
  0x1c   : > { %1768 = sst [smem:[#allocation17_spill]] %s1516_s28  ;;  %p412_p13 = scmp.lt.s32.totalorder (!%p349_p10), %s1362_s14, 2 }
  0x1d   : > { %p420_p0 = scmp.lt.s32.totalorder (!%p349_p10), %s1362_s14, 1  ;;  %p1174_p1 = scmp.ne.s32.totalorder (!%p349_p10), %s1362_s14, 0 }
  0x20   : > { %s407_s10 = scalar_select %p406_p12, %s1366_s15, 1 }
  0x21   : > { %s413_s7 = scalar_select %p412_p13, %s1362_s14, 2 }
  0x22   : > { %s1169_s19 = sshll.u32 %s407_s10, 3  ;;  %s1193_s22 = smul.u32 3, %s407_s10 }
  0x23   : > { %s409_s27 = scalar_lea.vmem %s1735_s0, %s1169_s19  ;;  %s1171_s13 = sshll.u32 %s407_s10, 1 }
  0x24   : > { %s415_s21 = sadd.s32 %s1193_s22, %s413_s7  ;;  %s1547_s7 = scalar_lea.vmem [#allocation5], %s1168_s30 }
  0x25   : > { %s1170_s20 = sshll.u32 %s415_s21, 1 }
  0x26   : > { %s1532_s28 = scalar_lea.vmem %s1739_s4, %s1170_s20 }
  0x27   : > { %s421_s24 = scalar_select %p420_p0, %s1362_s14, 1 }
  0x28   : > { %439 = sbr.rel (%p1174_p1) target bundleno = 351 (0x15f), region = 60 }
  0x29   : > { %s1535_s29 = sadd.s32 %s1171_s13, %s421_s24 }
  0x2a   : > { %s1172_s11 = sshll.u32 %s1535_s29, 1  ;;  %s432_s25 = scalar_lea.vmem %s1741_s6, %s1535_s29 }
  0x2b   : > { %s1545_s21 = scalar_lea.vmem %s1740_s5, %s1172_s11 }
  0x2d   : > { %v441_v0 = vld [vmem:[%s409_s27] sm:$0xff]  ;;  %v1380_v1 = vmov 0   ;;  %vm448_vm0 = vcmask 31744   ;;  %v462_v17 = vld [vmem:[%s1738_s3 + $0x8] sm:$0x3]  ;;  %vm495_vm1 = vcmask 27648  }
  0x2e   : > { %1279 = vset.pattern.permute.xlu0 %v1380_v1  ;;  %v440_v2 = vld [vmem:[%s1736_s1] sm:$0xff]  ;;  %v463_v20 = vld [vmem:[%s1738_s3 + $0xa] sm:$0x3]  ;;  %v464_v25 = vld [vmem:[%s1738_s3 + $0xc] sm:$0x3]  ;;  %v471_v26 = vunpack.c.l.bf16 %v462_v17  ;;  %vm544_vm5 = vcmask 25600  }
  0x2f   : > { %444 = vperm.xlu0 %1279, %v441_v0   ;;  %v456_v10 = vld [vmem:[%s1737_s2] sm:$0x1]  ;;  %v459_v13 = vld [vmem:[%s1738_s3 + $0x2] sm:$0x3]  ;;  %v460_v14 = vld [vmem:[%s1738_s3 + $0x4] sm:$0x3]  ;;  %v472_v27 = vunpack.c.l.bf16 %v463_v20  ;;  %v473_v33 = vunpack.c.l.bf16 %v464_v25 }
  0x30   : > { %v458_v12 = vld [vmem:[%s1738_s3] sm:$0x3]  ;;  %v461_v15 = vld [vmem:[%s1738_s3 + $0x6] sm:$0x3]  ;;  %v468_v21 = vunpack.c.l.bf16 %v459_v13  ;;  %v469_v22 = vunpack.c.l.bf16 %v460_v14  ;;  %v465_v28 = vld [vmem:[%s1738_s3 + $0xe] sm:$0x3] }
  0x31   : > { %v467_v18 = vunpack.c.l.bf16 %v458_v12  ;;  %v470_v23 = vunpack.c.l.bf16 %v461_v15  ;;  %v466_v38 = vld [vmem:[%s1738_s3 + $0x10] sm:$0x3]  ;;  %v474_v39 = vunpack.c.l.bf16 %v465_v28 }
  0x32   : > { %v475_v45 = vunpack.c.l.bf16 %v466_v38 }
  0xa1   : > { %v445_v3 = vpop.permute.xlu0 %444 }
  0xa2   : > { %v447_v4 = vmul.f32 %v445_v3, %v440_v2 }
  0xa4   : > { %v449_v5 = vsel %vm448_vm0, %v447_v4, 0.0 }
  0xa5   : > { %v450_v6 = vrot.slane %v449_v5, 4 }
  0xa7   : > { %v451_v7 = vadd.f32 %v450_v6, %v449_v5 }
  0xa9   : > { %v452_v8 = vrot.slane %v451_v7, 2 }
  0xab   : > { %v453_v9 = vadd.f32 %v452_v8, %v451_v7 }
  0xad   : > { %v454_v11 = vrot.slane %v453_v9, 1 }
  0xaf   : > { %v455_v16 = vadd.f32 %v454_v11, %v453_v9 }
  0xb1   : > { %v457_v19 = vadd.f32 %v456_v10, %v455_v16 }
  0xb3   : > { %v476_v24 = vperm.slane %v457_v19, 0 }
  0xb5   : > { %v477_v29 = vmul.f32 %v476_v24, %v467_v18  ;;  %v478_v30 = vmul.f32 %v476_v24, %v468_v21  ;;  %v479_v31 = vmul.f32 %v476_v24, %v469_v22  ;;  %v480_v32 = vmul.f32 %v476_v24, %v470_v23 }
  0xb6   : > { %v481_v34 = vmul.f32 %v476_v24, %v471_v26  ;;  %v482_v40 = vmul.f32 %v476_v24, %v472_v27  ;;  %v483_v46 = vmul.f32 %v476_v24, %v473_v33  ;;  %v484_v50 = vmul.f32 %v476_v24, %v474_v39 }
  0xb7   : > { %v486_v35 = vmul.f32 %v477_v29, %v477_v29  ;;  %v487_v36 = vmul.f32 %v478_v30, %v478_v30  ;;  %v488_v37 = vmul.f32 %v479_v31, %v479_v31  ;;  %v489_v41 = vmul.f32 %v480_v32, %v480_v32 }
  0xb8   : > { %v490_v47 = vmul.f32 %v481_v34, %v481_v34  ;;  %v491_v51 = vmul.f32 %v482_v40, %v482_v40  ;;  %v485_v54 = vmul.f32 %v476_v24, %v475_v45  ;;  %v492_v55 = vmul.f32 %v483_v46, %v483_v46 }
  0xb9   : > { %v496_v42 = vsel %vm495_vm1, %v486_v35, 0.0  ;;  %v497_v43 = vsel %vm495_vm1, %v487_v36, 0.0  ;;  %v499_v48 = vsel %vm495_vm1, %v488_v37, 0.0  ;;  %v501_v52 = vsel %vm495_vm1, %v489_v41, 0.0 }
  0xba   : > { %v498_v44 = vadd.f32 %v497_v43, %v496_v42  ;;  %v503_v56 = vsel %vm495_vm1, %v490_v47, 0.0  ;;  %v493_v58 = vmul.f32 %v484_v50, %v484_v50  ;;  %v505_v59 = vsel %vm495_vm1, %v491_v51, 0.0 }
  0xbb   : > { %v494_v61 = vmul.f32 %v485_v54, %v485_v54  ;;  %v507_v62 = vsel %vm495_vm1, %v492_v55, 0.0 }
  0xbc   : > { %v500_v49 = vadd.f32 %v499_v48, %v498_v44  ;;  %v509_v0 = vsel %vm495_vm1, %v493_v58, 0.0 }
  0xbd   : > { %v511_v2 = vsel %vm495_vm1, %v494_v61, 0.0 }
  0xbe   : > { %v502_v53 = vadd.f32 %v501_v52, %v500_v49 }
  0xc0   : > { %v504_v57 = vadd.f32 %v503_v56, %v502_v53 }
  0xc2   : > { %v506_v60 = vadd.f32 %v505_v59, %v504_v57 }
  0xc4   : > { %v508_v63 = vadd.f32 %v507_v62, %v506_v60 }
  0xc6   : > { %v510_v1 = vadd.f32 %v509_v0, %v508_v63 }
  0xc8   : > { %v512_v3 = vadd.f32 %v511_v2, %v510_v1 }
  0xca   : > { %513 = vadd.xlane.f32.xlu0 %v512_v3 }
 0x13d   : > { %v514_v4 = vpop.xlane.xlu0 %513 }
 0x13e   : > { %v515_v5 = vadd.f32 1e-08, %v514_v4 }
 0x140   : > { %1280 = vrsqrt.f32 %v515_v5  ;;  %vm522_vm3 = vweird.f32 %v515_v5 }
 0x146   : > { %v1281_v6 = vpop.eup %1280 }
 0x147   : > { %v517_v7 = vmul.f32 %v1281_v6, %v515_v5  ;;  %vm523_vm2 = vweird.f32 %v1281_v6 }
 0x148   : > { %vm524_vm4 = vmor %vm522_vm3, %vm523_vm2 }
 0x149   : > { %v518_v8 = vmul.f32 %v1281_v6, %v517_v7 }
 0x14b   : > { %v519_v9 = vmul.f32 0.5, %v518_v8 }
 0x14d   : > { %v520_v10 = vsub.f32 1.5, %v519_v9 }
 0x14f   : > { %v521_v11 = vmul.f32 %v1281_v6, %v520_v10 }
 0x151   : > { %v525_v12 = vsel %vm524_vm4, %v1281_v6, %v521_v11 }
 0x152   : > { %v526_v13 = vmul.f32 %v525_v12, %v477_v29  ;;  %v527_v14 = vmul.f32 %v525_v12, %v478_v30  ;;  %v528_v15 = vmul.f32 %v525_v12, %v479_v31  ;;  %v529_v16 = vmul.f32 %v525_v12, %v480_v32 }
 0x153   : > { %v530_v17 = vmul.f32 %v525_v12, %v481_v34  ;;  %v531_v18 = vmul.f32 %v525_v12, %v482_v40  ;;  %v532_v19 = vmul.f32 %v525_v12, %v483_v46  ;;  %v533_v23 = vmul.f32 %v525_v12, %v484_v50 }
 0x154   : > { %v535_v20 = vpack.c.bf16 %v526_v13, %v526_v13  ;;  %v536_v21 = vpack.c.bf16 %v527_v14, %v527_v14  ;;  %v537_v22 = vpack.c.bf16 %v528_v15, %v528_v15  ;;  %v538_v24 = vpack.c.bf16 %v529_v16, %v529_v16 }
 0x155   : > { %v534_v25 = vmul.f32 %v525_v12, %v485_v54  ;;  %v539_v26 = vpack.c.bf16 %v530_v17, %v530_v17  ;;  %v540_v27 = vpack.c.bf16 %v531_v18, %v531_v18  ;;  %v541_v28 = vpack.c.bf16 %v532_v19, %v532_v19 }
 0x156   : > { %545 = vst.msk [vmem:[#allocation3] sm:$0x3] %vm544_vm5, %v535_v20  ;;  %v542_v29 = vpack.c.bf16 %v533_v23, %v533_v23 }
 0x157   : > { %546 = vst.msk [vmem:[#allocation3 + $0x2] sm:$0x3] %vm544_vm5, %v536_v21  ;;  %v543_v30 = vpack.c.bf16 %v534_v25, %v534_v25 }
 0x158   : > { %547 = vst.msk [vmem:[#allocation3 + $0x4] sm:$0x3] %vm544_vm5, %v537_v22 }
 0x159   : > { %548 = vst.msk [vmem:[#allocation3 + $0x6] sm:$0x3] %vm544_vm5, %v538_v24 }
 0x15a   : > { %549 = vst.msk [vmem:[#allocation3 + $0x8] sm:$0x3] %vm544_vm5, %v539_v26 }
 0x15b   : > { %550 = vst.msk [vmem:[#allocation3 + $0xa] sm:$0x3] %vm544_vm5, %v540_v27 }
 0x15c   : > { %551 = vst.msk [vmem:[#allocation3 + $0xc] sm:$0x3] %vm544_vm5, %v541_v28 }
 0x15d   : > { %552 = vst.msk [vmem:[#allocation3 + $0xe] sm:$0x3] %vm544_vm5, %v542_v29 }
 0x15e   : > { %553 = vst.msk [vmem:[#allocation3 + $0x10] sm:$0x3] %vm544_vm5, %v543_v30 }
 0x15f PF: > { %v559_v31 = vlaneseq  ;;  %v1381_v32 = vmov 0   ;;  %s1382_s30 = smov 127   ;;  %s1383_s10 = smov 15   ;;  %v554_v45 = vld [vmem:[%s1532_s28] sm:$0x3]  ;;  %vm557_vm14 = vcmask 254976  }
 0x160   : > { %1282 = vset.pattern.permute.xlu1 %v1381_v32  ;;  %1283 = vset.pattern.permute.xlu0 %v1381_v32  ;;  %v1601_v37 = vunpack.c.l.b16 %v1381_v32  ;;  %v1603_v38 = vunpack.c.h.b16 %v1381_v32  ;;  %s1384_s22 = smov 31   ;;  %s1385_s27 = smov 1   ;;  %555 = vst [vmem:[#allocation2 + $0x2] sm:$0x3] %v554_v45  ;;  %v556_v46 = vld [vmem:[%s1545_s21] sm:$0x3] }
 0x161   : > { %v560_v33 = vand.u32 127, %v559_v31  ;;  %s1386_s19 = smov 17   ;;  %558 = vst.msk [vmem:[#allocation2 + $0x4] sm:$0x3] %vm557_vm14, %v556_v46  ;;  %vm597_vm15 = vcmask 1039360   ;;  %vm731_vm3 = vcmask 121856  }
 0x162   : > { %vm618_vm4 = vcmask 7168   ;;  %s1387_s28 = smov 33   ;;  %s1388_s21 = smov 113  }
 0x163   : > { %v565_v34 = vand.u32 15, %v560_v33  ;;  %s1389_s26 = smov 112   ;;  %s1390_s13 = smov 111  }
 0x164   : > { %s1391_s16 = smov 97   ;;  %s1392_s11 = smov 96  }
 0x165   : > { %v573_v35 = vadd.s32 4294967295, %v565_v34  ;;  %v577_v36 = vadd.s32 1, %v565_v34  ;;  %s1393_s17 = smov 95   ;;  %s1002_s23 = sld [smem:[#allocation4]] }
 0x166   : > { %s1304_s18 = scalar_lea.hbm %s1744_s9, 16 }
 0x167   : > { %vm574_vm6 = vcmp.ge.s32.totalorder %v573_v35, 0  ;;  %vm579_vm7 = vcmp.lt.s32.totalorder %v577_v36, 16  ;;  %v581_v53 = vld [vmem:[#allocation2] sm:$0xf] }
 0x168   : > { %v584_v39 = vsel %vm574_vm6, 1, %v1381_v32  ;;  %v670_v40 = vsel %vm579_vm7, 1, %v1381_v32  ;;  %v667_v0 = vld [vmem:[#allocation2 + $0x2] sm:$0xf] }
 0x169   : > { %v1175_v41 = vunpack.i.l.s16 %v584_v39  ;;  %v1179_v42 = vunpack.i.l.s16 %v670_v40  ;;  %v727_v5 = vld [vmem:[#allocation2 + $0x2] sm:$0xf] }
 0x16a   : > { %v777_v15 = vld [vmem:[#allocation2 + $0x2] sm:$0xf] }
 0x16b   : > { %vm590_vm8 = vcmp.ne.s32.totalorder %v1175_v41, %v1601_v37  ;;  %vm591_vm9 = vcmp.ne.s32.totalorder %v1175_v41, %v1603_v38  ;;  %vm676_vm11 = vcmp.ne.s32.totalorder %v1179_v42, %v1601_v37  ;;  %vm677_vm12 = vcmp.ne.s32.totalorder %v1179_v42, %v1603_v38  ;;  %v814_v20 = vld [vmem:[#allocation2 + $0x2] sm:$0xf] }
 0x16c   : > { %vm592_vm10 = vmpackc.low %vm591_vm9, %vm590_vm8  ;;  %v864_v26 = vld [vmem:[#allocation2 + $0x2] sm:$0xf] }
 0x16d   : > { %v593_v43 = vsel %vm592_vm10, 65537, %v1381_v32  ;;  %vm678_vm13 = vmpackc.low %vm677_vm12, %vm676_vm11  ;;  %vm818_vm11 = vcmask 138240   ;;  %vm868_vm12 = vcmask 252928   ;;  %v914_v31 = vld [vmem:[#allocation2 + $0x2] sm:$0xf] }
 0x16e   : > { %594 = vrot.lane.b32.xlu0 %v593_v43, %s1382_s30  ;;  %728 = vrot.lane.b32.xlu1 %v593_v43, %s1383_s10  ;;  %v1610_v44 = vsel %vm678_vm13, 65537, %v1381_v32  ;;  %v642_v40 = vld [vmem:[#allocation2 + $0x2] sm:$0x3]  ;;  %s1189_s10 = sshll.u32 %s1366_s15, 1 }
 0x16f   : > { %865 = vrot.lane.b32.xlu2 %v593_v43, %s1384_s22  ;;  %v951_v46 = vld [vmem:[#allocation2 + $0x2] sm:$0xf]  ;;  %s1033_s22 = sadd.s32 %s1362_s14, %s1189_s10  ;;  %s1772_s14 = sand.u32 1, %s1354_s12  }
 0x170   : > { %s1023_s15 = scalar_lea.sflag [#allocation6], %s1772_s14 }
 0x176   : > { %680 = vrot.lane.b32.xlu0 %v1610_v44, %s1385_s27  ;;  %815 = vrot.lane.b32.xlu1 %v1610_v44, %s1386_s19 }
 0x1c9   : > { %v866_v11 = vpop.permute.xlu2 %865 }
 0x1ca   : > { %v867_v14 = vrot.slane %v866_v11, 6 }
 0x1cc   : > { %v869_v19 = vsel %vm868_vm12, %v867_v14, %v866_v11  ;;  %vm890_vm12 = vcmask 793600   ;;  %v829_v11 = vld [vmem:[#allocation3 + $0xa] sm:$0x3] }
 0x1cd   : > { %v870_v21 = vunpack.c.l.b16 %v869_v19  ;;  %v871_v22 = vunpack.c.h.b16 %v869_v19 }
 0x1e0   : > { %v595_v47 = vpop.permute.xlu0 %594  ;;  %v729_v50 = vpop.permute.xlu1 %728 }
 0x1e1   : > { %v596_v48 = vrot.slane %v595_v47, 6  ;;  %v730_v54 = vrot.slane %v729_v50, 6 }
 0x1e3   : > { %v598_v49 = vsel %vm597_vm15, %v596_v48, %v595_v47  ;;  %v732_v58 = vsel %vm731_vm3, %v730_v54, %v729_v50  ;;  %v644_v50 = vld [vmem:[#allocation3 + $0x2] sm:$0x3] }
 0x1e4   : > { %v599_v51 = vunpack.c.l.b16 %v598_v49  ;;  %v600_v52 = vunpack.c.h.b16 %v598_v49  ;;  %v733_v62 = vunpack.c.l.b16 %v732_v58  ;;  %v734_v63 = vunpack.c.h.b16 %v732_v58 }
 0x1e6   : > { %vm603_vm0 = vcmp.ne.s32.totalorder %v599_v51, %v1601_v37  ;;  %vm604_vm1 = vcmp.ne.s32.totalorder %v600_v52, %v1603_v38  ;;  %vm737_vm8 = vcmp.ne.s32.totalorder %v733_v62, %v1601_v37  ;;  %vm738_vm9 = vcmp.ne.s32.totalorder %v734_v63, %v1603_v38  ;;  %v607_v52 = vld [vmem:[#allocation3] sm:$0x3] }
 0x1e7   : > { %vm605_vm2 = vmpackc.low %vm604_vm1, %vm603_vm0  ;;  %vm874_vm1 = vcmp.ne.s32.totalorder %v870_v21, %v1601_v37 }
 0x1e8   : > { %v606_v55 = vsel %vm605_vm2, %v581_v53, 0  ;;  %v681_v56 = vpop.permute.xlu0 %680  ;;  %v816_v4 = vpop.permute.xlu1 %815  ;;  %vm739_vm10 = vmpackc.low %vm738_vm9, %vm737_vm8  ;;  %vm875_vm2 = vcmp.ne.s32.totalorder %v871_v22, %v1603_v38 }
 0x1e9   : > { %609 = vst [vmem:[#allocation1] ss:$4 sm:$0xff] %v606_v55  ;;  %v682_v57 = vrot.slane %v681_v56, 6  ;;  %v817_v6 = vrot.slane %v816_v4, 6  ;;  %v740_v7 = vsel %vm739_vm10, %v727_v5, 0  ;;  %vm876_vm3 = vmpackc.low %vm875_vm2, %vm874_vm1  ;;  %vm620_vm10 = vcmask 31744  }
 0x1ea   : > { %v877_v27 = vsel %vm876_vm3, %v864_v26, 0 }
 0x1eb   : > { %v683_v59 = vsel %vm618_vm4, %v682_v57, %v681_v56  ;;  %v819_v10 = vsel %vm818_vm11, %v817_v6, %v816_v4  ;;  %v693_v56 = vld [vmem:[#allocation3 + $0x4] sm:$0x3]  ;;  %vm790_vm11 = vcmask 916480  }
 0x1ec   : > { %v684_v60 = vunpack.c.l.b16 %v683_v59  ;;  %v685_v61 = vunpack.c.h.b16 %v683_v59  ;;  %v820_v12 = vunpack.c.l.b16 %v819_v10  ;;  %v821_v13 = vunpack.c.h.b16 %v819_v10 }
 0x1ee   : > { %vm688_vm5 = vcmp.ne.s32.totalorder %v684_v60, %v1601_v37  ;;  %vm689_vm6 = vcmp.ne.s32.totalorder %v685_v61, %v1603_v38  ;;  %vm1630_vm13 = vcmp.ne.s32.totalorder %v820_v12, %v1601_v37  ;;  %vm825_vm14 = vcmp.ne.s32.totalorder %v821_v13, %v1603_v38  ;;  %v742_v61 = vld [vmem:[#allocation3 + $0x6] sm:$0x3]  ;;  %v879_v12 = vld [vmem:[#allocation3 + $0xc] sm:$0x3] }
 0x1ef   : > { %vm690_vm7 = vmpackc.low %vm689_vm6, %vm688_vm5  ;;  %vm955_vm5 = vcmask 269312   ;;  %vm624_vm6 = vcmask 1041408  }
 0x1f0   : > { %v610_v1 = vld.sshfl [vmem:[#allocation1] sm:$0xff pattern:$0x73625140]  ;;  %v612_v2 = vld.sshfl [vmem:[#allocation1 + $0x8] sm:$0xff pattern:$0x73625140]  ;;  %vm826_vm0 = vmpackc.low %vm825_vm14, %vm1630_vm13 }
 0x1f1   : > { %v691_v3 = vsel %vm690_vm7, %v667_v0, 0  ;;  %616 = vrot.lane.b32.xlu0 %v612_v2, %s1385_s27  ;;  %614 = vrot.lane.b32.xlu2 %v610_v1, %s1385_s27  ;;  %v827_v23 = vsel %vm826_vm0, %v814_v20, 0  ;;  %v649_v42 = vsel %vm624_vm6, %v642_v40, 0  ;;  %vm927_vm13 = vcmask 785408   ;;  %s1190_s27 = sshll.u32 %s1033_s22, 2 }
 0x1f2   : > { %695 = vst [vmem:[#allocation1] ss:$4 sm:$0xff] %v691_v3  ;;  %658 = vmatpush.bf16.msra.mxu1 %v649_v42  ;;  %v779_v3 = vld [vmem:[#allocation3 + $0x8] sm:$0x3]  ;;  %vm977_vm14 = vcmask 777216   ;;  %s1035_s29 = scalar_lea.hbm %s1744_s9, %s1190_s27 }
 0x1f5   : > { %1178 = vmatmul.msk.bf16.vlgmr.msra.gmra.mxu1 %vm620_vm10, %v644_v50 }
 0x1f9   : > { %v698_v8 = vld.sshfl [vmem:[#allocation1 + $0x8] sm:$0xff pattern:$0x73625140]  ;;  %v696_v9 = vld.sshfl [vmem:[#allocation1] sm:$0xff pattern:$0x73625140] }
 0x1fa   : > { %702 = vrot.lane.b32.xlu2 %v698_v8, %s1382_s30  ;;  %700 = vrot.lane.b32.xlu1 %v696_v9, %s1382_s30  ;;  %744 = vst [vmem:[#allocation1] ss:$4 sm:$0xff] %v740_v7 }
 0x201   : > { %v745_v17 = vld.sshfl [vmem:[#allocation1] sm:$0xff pattern:$0x73625140]  ;;  %v747_v18 = vld.sshfl [vmem:[#allocation1 + $0x8] sm:$0xff pattern:$0x73625140] }
 0x202   : > { %952 = vrot.lane.b32.xlu2 %v1610_v44, %s1387_s28  ;;  %749 = vrot.lane.b32.xlu0 %v745_v17, %s1388_s21  ;;  %781 = vst [vmem:[#allocation1] ss:$4 sm:$0xff] %v777_v15  ;;  %v916_v17 = vld [vmem:[#allocation3 + $0xe] sm:$0x3] }
 0x203   : > { %751 = vrot.lane.b32.xlu1 %v747_v18, %s1388_s21  ;;  %v1010_v18 = vld [vmem:[%s1743_s8] sm:$0xf]  ;;  %s1037_s21 = sshll.u32 %s1547_s7, 4  ;;  %s1038_s21 = int_to_ptr.vmem [resolvable:$true] %s1037_s21 }
 0x209   : > { %v782_v24 = vld.sshfl [vmem:[#allocation1] sm:$0xff pattern:$0x73625140]  ;;  %v784_v25 = vld.sshfl [vmem:[#allocation1 + $0x8] sm:$0xff pattern:$0x73625140] }
 0x20a   : > { %786 = vrot.lane.b32.xlu0 %v782_v24, %s1389_s26  ;;  %831 = vst [vmem:[#allocation1] ss:$4 sm:$0xff] %v827_v23  ;;  %v966_v23 = vld [vmem:[#allocation3 + $0x10] sm:$0x3] }
 0x20b   : > { %788 = vrot.lane.b32.xlu1 %v784_v25, %s1389_s26  ;;  %s1039_s26 = sshll.u32 %s1035_s29, 4  ;;  %s1040_s26 = int_to_ptr.hbm [resolvable:$true] %s1039_s26 }
 0x211   : > { %v832_v28 = vld.sshfl [vmem:[#allocation1] sm:$0xff pattern:$0x73625140]  ;;  %v834_v29 = vld.sshfl [vmem:[#allocation1 + $0x8] sm:$0xff pattern:$0x73625140] }
 0x212   : > { %838 = vrot.lane.b32.xlu0 %v834_v29, %s1390_s13  ;;  %881 = vst [vmem:[#allocation1] ss:$4 sm:$0xff] %v877_v27  ;;  %836 = vrot.lane.b32.xlu2 %v832_v28, %s1390_s13  ;;  %s1298_s13 = sshra.s32 %s1040_s26, 4  ;;  %s1299_s13 = int_to_ptr.hbm [resolvable:$true] %s1298_s13 }
 0x213   : > { %p1305_p6 = scmp.lt.s32.totalorder %s1299_s13, %s1744_s9 }
 0x219   : > { %v882_v30 = vld.sshfl [vmem:[#allocation1] sm:$0xff pattern:$0x73625140]  ;;  %v884_v32 = vld.sshfl [vmem:[#allocation1 + $0x8] sm:$0xff pattern:$0x73625140] }
 0x21a   : > { %886 = vrot.lane.b32.xlu1 %v882_v30, %s1391_s16  ;;  %888 = vrot.lane.b32.xlu2 %v884_v32, %s1391_s16  ;;  %918 = vst [vmem:[#allocation1] ss:$4 sm:$0xff] %v914_v31  ;;  %s1300_s16 = scalar_lea.hbm %s1299_s13, 4 }
 0x21b   : > { %p1301_p2 = scmp.ne.s32.totalorder %s1299_s13, %s1300_s16  ;;  %p1306_p7 = scmp.lt.s32.totalorder %s1304_s18, %s1300_s16 }
 0x21d   : > { %p1302_p4 = pnand %p1301_p2, %p1498_p3  ;;  %p1307_p9 = por %p1306_p7, %p1305_p6 }
 0x21f   : > { %p1303_p5 = pneg %p1302_p4 }
 0x221   : > { %v921_v33 = vld.sshfl [vmem:[#allocation1 + $0x8] sm:$0xff pattern:$0x73625140]  ;;  %v919_v34 = vld.sshfl [vmem:[#allocation1] sm:$0xff pattern:$0x73625140]  ;;  %p1308_p10 = pnand %p1307_p9, %p1303_p5 }
 0x222   : > { %925 = vrot.lane.b32.xlu1 %v921_v33, %s1392_s11  ;;  %923 = vrot.lane.b32.xlu0 %v919_v34, %s1392_s11 }
 0x22a   : > { %1013 = vperm.xlu1 %1282, %v1010_v18  }
 0x24b   : > { %v615_v35 = vpop.permute.xlu2 %614 }
 0x254   : > { %v703_v36 = vpop.permute.xlu2 %702 }
 0x25c   : > { %v953_v39 = vpop.permute.xlu2 %952 }
 0x25d   : > { %v954_v41 = vrot.slane %v953_v39, 6 }
 0x25f   : > { %v956_v43 = vsel %vm955_vm5, %v954_v41, %v953_v39 }
 0x260   : > { %v957_v44 = vunpack.c.l.b16 %v956_v43  ;;  %v958_v45 = vunpack.c.h.b16 %v956_v43 }
 0x262   : > { %vm961_vm7 = vcmp.ne.s32.totalorder %v957_v44, %v1601_v37  ;;  %vm962_vm8 = vcmp.ne.s32.totalorder %v958_v45, %v1603_v38 }
 0x263   : > { %vm963_vm9 = vmpackc.low %vm962_vm8, %vm961_vm7  ;;  %v617_v47 = vpop.permute.xlu0 %616 }
 0x264   : > { %v964_v48 = vsel %vm963_vm9, %v951_v46, 0  ;;  %v619_v49 = vsel %vm618_vm4, %v615_v35, %v617_v47  ;;  %vm753_vm4 = vcmask 924672  }
 0x265   : > { %968 = vst [vmem:[#allocation1] ss:$4 sm:$0xff] %v964_v48  ;;  %v626_v51 = vsel %vm624_vm6, %v619_v49, 0 }
 0x266   : > { %635 = vmatpush.bf16.msra.mxu0 %v626_v51 }
 0x269   : > { %1177 = vmatmul.msk.bf16.vlgmr.msra.gmra.mxu0 %vm620_vm10, %v607_v52 }
 0x26c   : > { %v701_v53 = vpop.permute.xlu1 %700  ;;  %v971_v37 = vld.sshfl [vmem:[#allocation1 + $0x8] sm:$0xff pattern:$0x73625140]  ;;  %v969_v54 = vld.sshfl [vmem:[#allocation1] sm:$0xff pattern:$0x73625140]  ;;  %v837_v2 = vpop.permute.xlu2 %836 }
 0x26d   : > { %975 = vrot.lane.b32.xlu0 %v971_v37, %s1393_s17  ;;  %973 = vrot.lane.b32.xlu2 %v969_v54, %s1393_s17  ;;  %v704_v38 = vsel %vm597_vm15, %v701_v53, %v703_v36  ;;  %vm840_vm15 = vcmask 908288  }
 0x26e   : > { %v709_v55 = vsel %vm624_vm6, %v704_v38, 0 }
 0x26f   : > { %718 = vmatpush.bf16.msra.mxu2 %v709_v55 }
 0x272   : > { %1181 = vmatmul.msk.bf16.vlgmr.msra.gmra.mxu2 %vm620_vm10, %v693_v56  ;;  %v660_v24 = vpop.f32.mrf.mxu1  ;;  %v1003_v56 = vld [vmem:[%s432_s25] sm:$0x1] }
 0x274   : > { %v750_v57 = vpop.permute.xlu0 %749  ;;  %v889_v7 = vpop.permute.xlu2 %888 }
 0x275   : > { %v752_v58 = vpop.permute.xlu1 %751 }
 0x276   : > { %v754_v59 = vsel %vm753_vm4, %v750_v57, %v752_v58  ;;  %v1004_v57 = vstv %s1002_s23 }
 0x277   : > { %v759_v60 = vsel %vm624_vm6, %v754_v59, 0  ;;  %v1005_v59 = vmul.f32 %v1004_v57, %v1003_v56 }
 0x278   : > { %768 = vmatpush.bf16.msra.mxu3 %v759_v60 }
 0x279   : > { %v1007_v60 = vperm.slane %v1005_v59, 0 }
 0x27a   : > { %v662_v26 = vpop.f32.mrf.mxu1 }
 0x27b   : > { %1182 = vmatmul.msk.bf16.vlgmr.msra.gmra.mxu3 %vm620_vm10, %v742_v61 }
 0x27c   : > { %v787_v62 = vpop.permute.xlu0 %786 }
 0x27d   : > { %v789_v63 = vpop.permute.xlu1 %788 }
 0x27e   : > { %v791_v0 = vsel %vm790_vm11, %v787_v62, %v789_v63 }
 0x27f   : > { %v796_v1 = vsel %vm624_vm6, %v791_v0, 0 }
 0x280   : > { %805 = vmatpush.bf16.msrb.mxu0 %v796_v1 }
 0x283   : > { %1183 = vmatmul.msk.bf16.vlgmr.msrb.gmra.mxu0 %vm620_vm10, %v779_v3 }
 0x284   : > { %v839_v4 = vpop.permute.xlu0 %838 }
 0x285   : > { %v841_v5 = vsel %vm840_vm15, %v837_v2, %v839_v4 }
 0x286   : > { %v846_v6 = vsel %vm624_vm6, %v841_v5, 0 }
 0x287   : > { %855 = vmatpush.bf16.msrb.mxu1 %v846_v6 }
 0x28a   : > { %1184 = vmatmul.msk.bf16.vlgmr.msrb.gmra.mxu1 %vm620_vm10, %v829_v11 }
 0x28c   : > { %v887_v8 = vpop.permute.xlu1 %886 }
 0x28d   : > { %v891_v9 = vsel %vm890_vm12, %v887_v8, %v889_v7 }
 0x28e   : > { %v896_v10 = vsel %vm624_vm6, %v891_v9, 0 }
 0x28f   : > { %905 = vmatpush.bf16.msrb.mxu2 %v896_v10 }
 0x292   : > { %1185 = vmatmul.msk.bf16.vlgmr.msrb.gmra.mxu2 %vm620_vm10, %v879_v12 }
 0x294   : > { %v926_v13 = vpop.permute.xlu1 %925  ;;  %v924_v14 = vpop.permute.xlu0 %923 }
 0x295   : > { %v928_v15 = vsel %vm927_vm13, %v924_v14, %v926_v13 }
 0x296   : > { %v933_v16 = vsel %vm624_vm6, %v928_v15, 0 }
 0x297   : > { %942 = vmatpush.bf16.msrb.mxu3 %v933_v16 }
 0x29a   : > { %1186 = vmatmul.msk.bf16.vlgmr.msrb.gmra.mxu3 %vm620_vm10, %v916_v17 }
 0x29c   : > { %v1014_v62 = vpop.permute.xlu1 %1013 }
 0x2c7   : > { %v974_v19 = vpop.permute.xlu2 %973 }
 0x2df   : > { %v976_v20 = vpop.permute.xlu0 %975 }
 0x2e0   : > { %v978_v21 = vsel %vm977_vm14, %v974_v19, %v976_v20 }
 0x2e1   : > { %v983_v22 = vsel %vm624_vm6, %v978_v21, 0 }
 0x2e2   : > { %992 = vmatpush.bf16.msra.mxu0 %v983_v22 }
 0x2e5   : > { %1187 = vmatmul.msk.bf16.vlgmr.msra.gmra.mxu0 %vm620_vm10, %v966_v23 }
 0x2e6   : > { %v637_v25 = vpop.f32.mrf.mxu0 }
 0x2e7   : > { %641 = vst [vmem:[%s1547_s7] sm:$0xf] %v637_v25 }
 0x2ee   : > { %v639_v27 = vpop.f32.mrf.mxu0  ;;  %v664_v28 = vld [vmem:[%s1547_s7] sm:$0xf] }
 0x2ef   : > { %v665_v29 = vadd.f32 %v664_v28, %v660_v24 }
 0x2f1   : > { %666 = vst [vmem:[%s1547_s7] sm:$0xf] %v665_v29 }
 0x2f5   : > { %v720_v30 = vpop.f32.mrf.mxu2 }
 0x2f8   : > { %v724_v31 = vld [vmem:[%s1547_s7] sm:$0xf] }
 0x2f9   : > { %v725_v32 = vadd.f32 %v724_v31, %v720_v30 }
 0x2fb   : > { %726 = vst [vmem:[%s1547_s7] sm:$0xf] %v725_v32 }
 0x2fd   : > { %v722_v33 = vpop.f32.mrf.mxu2 }
 0x2fe   : > { %v770_v34 = vpop.f32.mrf.mxu3 }
 0x300   : > { %v807_v35 = vpop.f32.mrf.mxu0 }
 0x302   : > { %v774_v36 = vld [vmem:[%s1547_s7] sm:$0xf] }
 0x303   : > { %v775_v39 = vadd.f32 %v774_v36, %v770_v34 }
 0x305   : > { %776 = vst [vmem:[%s1547_s7] sm:$0xf] %v775_v39 }
 0x306   : > { %v772_v40 = vpop.f32.mrf.mxu3 }
 0x307   : > { %v857_v45 = vpop.f32.mrf.mxu1 }
 0x308   : > { %v809_v41 = vpop.f32.mrf.mxu0 }
 0x30c   : > { %v811_v42 = vld [vmem:[%s1547_s7] sm:$0xf] }
 0x30d   : > { %v812_v43 = vadd.f32 %v811_v42, %v807_v35 }
 0x30f   : > { %813 = vst [vmem:[%s1547_s7] sm:$0xf] %v812_v43  ;;  %v859_v47 = vpop.f32.mrf.mxu1 }
 0x315   : > { %v907_v48 = vpop.f32.mrf.mxu2 }
 0x316   : > { %v861_v44 = vld [vmem:[%s1547_s7] sm:$0xf] }
 0x317   : > { %v862_v46 = vadd.f32 %v861_v44, %v857_v45 }
 0x319   : > { %863 = vst [vmem:[%s1547_s7] sm:$0xf] %v862_v46 }
 0x31d   : > { %v909_v51 = vpop.f32.mrf.mxu2  ;;  %v944_v53 = vpop.f32.mrf.mxu3 }
 0x320   : > { %v911_v49 = vld [vmem:[%s1547_s7] sm:$0xf] }
 0x321   : > { %v912_v50 = vadd.f32 %v911_v49, %v907_v48 }
 0x323   : > { %913 = vst [vmem:[%s1547_s7] sm:$0xf] %v912_v50 }
 0x325   : > { %v946_v54 = vpop.f32.mrf.mxu3 }
 0x32a   : > { %v948_v52 = vld [vmem:[%s1547_s7] sm:$0xf] }
 0x32b   : > { %v949_v37 = vadd.f32 %v948_v52, %v944_v53 }
 0x32d   : > { %950 = vst [vmem:[%s1547_s7] sm:$0xf] %v949_v37 }
 0x334   : > { %v998_v38 = vld [vmem:[%s1547_s7] sm:$0xf] }
 0x362   : > { %v994_v55 = vpop.f32.mrf.mxu0 }
 0x363   : > { %v999_v58 = vadd.f32 %v998_v38, %v994_v55 }
 0x365   : > { %1000 = vst [vmem:[%s1547_s7] sm:$0xf] %v999_v58 }
 0x36a   : > { %v996_v61 = vpop.f32.mrf.mxu0 }
 0x36c   : > { %v1001_v63 = vld [vmem:[%s1547_s7] sm:$0xf] }
 0x36d   : > { %v1009_v0 = vadd.f32 %v1007_v60, %v1001_v63 }
 0x36f   : > { %v1016_v1 = vadd.f32 %v1014_v62, %v1009_v0 }
 0x371   : > { %vm1017_vm0 = vcmp.ge.f32.partialorder %v1016_v1, 0.0  ;;  %v1018_v2 = vmul.f32 0.2, %v1016_v1 }
 0x373   : > { %v1019_v3 = vsel %vm1017_vm0, %v1016_v1, %v1018_v2 }
 0x374   : > { %v1020_v4 = vmul.f32 1.4142135, %v1019_v3 }
 0x376   : > { %1021 = vst [vmem:[%s1547_s7] sm:$0xf] %v1020_v4 }
 0x377   : > { %1311 = shalt.err (!%p1308_p10)
}
 0x378   : > { %1194 = dma.vmem_to_hbm [thread:$0]  (%p1498_p3), %s1038_s21, 64, %s1040_s26, %s1023_s15  }
 0x379 PF: > { %s1773_s7 = sld [smem:[#allocation12_spill]] }
 0x37a   : > { %s1774_s24 = sld [smem:[#allocation8_spill]] }
 0x37f   : > { %p1200_p11 = scmp.ge.s32.totalorder %s1773_s7, 2 }
 0x380   : > { %s1051_s10 = sand.u32 1, %s1774_s24  }
 0x381   : > { %p1197_p12 = pnand %p1200_p11, %p1507_p8  ;;  %s1052_s22 = scalar_lea.sflag [#allocation6], %s1051_s10 }
 0x383   : > { %p1198_p13 = pneg %p1197_p12 }
 0x385   : > { %1345 = dma.done.wait (%p1198_p13), %s1052_s22, 64  }
 0x386   : > { %1347 = vsyncadd (%p1198_p13), %s1052_s22, 4294967232  ;;  %s23_s18 = sadd.s32 1, %s1773_s7   ;;  %s1776_s27 = sld [smem:[#allocation9_spill]] }
 0x387   : > { %p20_p0 = scmp.ge.s32.totalorder %s23_s18, 6   ;;  %s1777_s13 = sld [smem:[#allocation17_spill]] }
 0x388   : > { %s1778_s14 = sld [smem:[#allocation10_spill]]  ;;  %s1782_s11 = smov %s1354_s12 }
 0x389   : > { %s1779_s15 = sld [smem:[#allocation11_spill]]  ;;  %22 = sbr.rel (!%p20_p0) target bundleno = 7 (0x7), region = 112 }
 0x38a   : > { %s1780_s16 = sld [smem:[#allocation13_spill]] }
 0x38b   : > { %s1781_s17 = sld [smem:[#allocation15_spill]] }
 0x38c   : > { %s1783_s12 = smov %s1776_s27 }
 0x38e   :  { %1058 = vsyncpa [#allocation6], 1 }
 0x38f   :  { %1060 = vsyncpa [#allocation6 + $0x1], 1 }

</bundles_post_ra>
